<compile_context>
chip_gen: v7x
topology: tpu7x:2x2x1
jax: 0.10.0
libtpu: 0.0.40
codegen_flags: <defaults>
</compile_context>

<pallas_src>
import jax
import jax.numpy as jnp
from jax.experimental import pallas as pl
from jax.experimental.pallas import tpu as pltpu

LANE = 128


def _round_up(x, m):
    return ((x + m - 1) // m) * m


def _vmem_budget_bytes():
    # Conservative: min(physical/4, 12 MiB) so the grid-less single-block
    # path always fits the smallest scoped-VMEM default (v5e: 16 MiB).
    try:
        cap = pltpu.get_tpu_info().vmem_capacity_bytes
    except Exception:
        cap = 64 * 1024 * 1024
    return min(cap // 4, 12 * 1024 * 1024)


# ----------------------------------------------------------------------------
# Kernels
# ----------------------------------------------------------------------------

def _linear_single_block_kernel(x_ref, w_ref, b_ref, o_ref):
    # x: (B, K), w: (K, N), b: (1, N) -> o: (B, N).  W already in (K, N)
    # layout, so this is a native MXU feed (no transpose / lane contraction).
    y = jnp.dot(x_ref[...], w_ref[...], preferred_element_type=jnp.float32)
    o_ref[...] = (y + b_ref[...]).astype(o_ref.dtype)


def _linear_tiled_kernel(x_ref, w_ref, b_ref, o_ref):
    # grid = (N_tiles, K_tiles); the o block's index_map is constant over the
    # K axis, so o_ref stays resident in VMEM and is used as the accumulator.
    k = pl.program_id(1)

    @pl.when(k == 0)
    def _():
        # Fold the bias into the accumulator init (no final-step add/copy).
        o_ref[...] = jnp.broadcast_to(b_ref[...], o_ref.shape).astype(o_ref.dtype)

    o_ref[...] += jnp.dot(x_ref[...], w_ref[...],
                          preferred_element_type=jnp.float32)


# ----------------------------------------------------------------------------
# One-time init (equivalent of the PyTorch module __init__): all weight
# layout work (transpose, padding, tile choice) happens here, never per call.
# ----------------------------------------------------------------------------

def init_classifier_params(weight, bias, *, force_tiled=False,
                           small_w_bytes=2 * 1024 * 1024,
                           tk_target=512, tn_target=512):
    """weight: (num_classes, input_dim) PyTorch layout; bias: (num_classes,)."""
    N, K = weight.shape
    assert bias.shape == (N,)
    w_kn = jnp.asarray(weight, jnp.float32).T          # (K, N): native MXU feed
    b2 = jnp.asarray(bias, jnp.float32).reshape(1, N)

    w_bytes = N * K * 4
    params = dict(N=N, K=K)

    if (not force_tiled) and w_bytes <= small_w_bytes:
        # Small weight: one grid-less kernel call, everything resident.
        params.update(mode="single", w=w_kn, b=b2)
        return params

    # Streamed / pipelined path: pick tiles, pad ONCE here.
    tk = min(tk_target, _round_up(K, LANE))            # multiple of 128
    k_pad = _round_up(K, tk)
    if N > tn_target:
        tn = tn_target                                  # multiple of 128
        n_out = _round_up(N, tn)
    else:
        tn = N                                          # full-dim block, no pad
        n_out = N
    if k_pad != K or n_out != N:
        # Zero-padding the reduction tail / extra classes is exact for Linear.
        w_kn = jnp.pad(w_kn, ((0, k_pad - K), (0, n_out - N)))
    if n_out != N:
        b2 = jnp.pad(b2, ((0, 0), (0, n_out - N)))
    params.update(mode="tiled", w=w_kn, b=b2,
                  tk=tk, tn=tn, k_pad=k_pad, n_out=n_out)
    return params


# ----------------------------------------------------------------------------
# Forward
# ----------------------------------------------------------------------------

def classifier_forward(params, x):
    """Pallas equivalent of: x.view(B, -1) @ W.T + b."""
    B = x.shape[0]
    x_flat = x.reshape(B, -1).astype(jnp.float32)       # glue: flatten only
    N, K = params["N"], params["K"]
    assert x_flat.shape[1] == K

    if params["mode"] == "single":
        # No grid => no pipeline => single-buffered, whole problem in VMEM.
        footprint = 4 * (B * K + K * N + N + B * N)
        assert footprint <= _vmem_budget_bytes(), (
            "single-block footprint too large; re-init with force_tiled=True")
        return pl.pallas_call(
            _linear_single_block_kernel,
            out_shape=jax.ShapeDtypeStruct((B, N), jnp.float32),
        )(x_flat, params["w"], params["b"])

    # ---- tiled / pipelined path ----
    tk, tn = params["tk"], params["tn"]
    k_pad, n_out = params["k_pad"], params["n_out"]
    if k_pad != K:
        # Only the (small) activation tensor is padded per call; W was padded
        # once at init.
        x_flat = jnp.pad(x_flat, ((0, 0), (0, k_pad - K)))
    nt, kt = n_out // tn, k_pad // tk

    out = pl.pallas_call(
        _linear_tiled_kernel,
        out_shape=jax.ShapeDtypeStruct((B, n_out), jnp.float32),
        grid_spec=pltpu.PrefetchScalarGridSpec(
            num_scalar_prefetch=0,
            grid=(nt, kt),                               # reduction axis last
            in_specs=[
                pl.BlockSpec((B, tk), lambda n, k: (0, k)),    # activations
                pl.BlockSpec((tk, tn), lambda n, k: (k, n)),   # W in (K, N)
                pl.BlockSpec((1, tn), lambda n, k: (0, n)),    # bias
            ],
            out_specs=pl.BlockSpec((B, tn), lambda n, k: (0, n)),
        ),
        compiler_params=pltpu.CompilerParams(
            # N axis parallel (v7x dual TensorCore), K axis is the reduction.
            dimension_semantics=("parallel", "arbitrary")),
    )(x_flat, params["w"], params["b"])

    return out[:, :N] if n_out != N else out


if __name__ == "__main__":
    # Shapes consistent with the module's forward:
    #   x: (B, C, H, W) = (2, 4, 16, 16) -> input_dim = 4*16*16 = 1024
    #   num_classes = 10
    B, C, H, W = 2, 4, 16, 16
    input_dim = C * H * W
    num_classes = 10

    key = jax.random.PRNGKey(0)
    kx, kw, kb = jax.random.split(key, 3)

    x = jax.random.normal(kx, (B, C, H, W), dtype=jnp.float32)
    bound = 1.0 / (input_dim ** 0.5)     # nn.Linear-style uniform init
    weight = jax.random.uniform(kw, (num_classes, input_dim),
                                minval=-bound, maxval=bound, dtype=jnp.float32)
    bias = jax.random.uniform(kb, (num_classes,),
                              minval=-bound, maxval=bound, dtype=jnp.float32)

    ref = x.reshape(B, -1) @ weight.T + bias

    # Small-weight case -> grid-less single-block kernel.
    params = init_classifier_params(weight, bias)
    out = jax.block_until_ready(classifier_forward(params, x))
    assert out.shape == (B, num_classes)
    assert jnp.allclose(out, ref, atol=1e-4, rtol=1e-4)

    # Also exercise the streamed K-tiled path (what large input_dim would use).
    params_t = init_classifier_params(weight, bias, force_tiled=True)
    out_t = jax.block_until_ready(classifier_forward(params_t, x))
    assert out_t.shape == (B, num_classes)
    assert jnp.allclose(out_t, ref, atol=1e-4, rtol=1e-4)

    print("KERNEL_OK")
</pallas_src>

<mosaic_0001>
module attributes {stable_mosaic.version = 11 : i64} {
  func.func @_linear_single_block_kernel(%arg0: memref<2x1024xf32, #tpu.memory_space<vmem>>, %arg1: memref<1024x10xf32, #tpu.memory_space<vmem>>, %arg2: memref<1x10xf32, #tpu.memory_space<vmem>>, %arg3: memref<2x10xf32, #tpu.memory_space<vmem>>) attributes {dimension_semantics = [], scalar_prefetch = 0 : i64, scratch_operands = 0 : i64, tpu.core_type = #tpu.core_type<tc>} {
    %c0 = arith.constant 0 : index
    %c0_0 = arith.constant 0 : index
    %0 = vector.load %arg0[%c0, %c0_0] : memref<2x1024xf32, #tpu.memory_space<vmem>>, vector<2x1024xf32>
    %c0_1 = arith.constant 0 : index
    %c0_2 = arith.constant 0 : index
    %1 = vector.load %arg1[%c0_1, %c0_2] : memref<1024x10xf32, #tpu.memory_space<vmem>>, vector<1024x10xf32>
    %cst = arith.constant dense<0.000000e+00> : vector<2x10xf32>
    %2 = tpu.matmul %0, %1, %cst {dimension_numbers = #tpu.dot_dimension_numbers<[1], [0], [0], [1], [0, 0, 1, 1], [], []>} : vector<2x1024xf32>, vector<1024x10xf32>, vector<2x10xf32> -> vector<2x10xf32>
    %c0_3 = arith.constant 0 : index
    %c0_4 = arith.constant 0 : index
    %3 = vector.load %arg2[%c0_3, %c0_4] : memref<1x10xf32, #tpu.memory_space<vmem>>, vector<1x10xf32>
    %4 = vector.broadcast %3 : vector<1x10xf32> to vector<2x10xf32>
    %5 = arith.addf %2, %4 : vector<2x10xf32>
    %c0_5 = arith.constant 0 : index
    %c0_6 = arith.constant 0 : index
    %6 = vector.load %arg3[%c0_5, %c0_6] : memref<2x10xf32, #tpu.memory_space<vmem>>, vector<2x10xf32>
    tpu.vector_store %arg3[%c0_5, %c0_6], %5 {strides = array<i32>} : memref<2x10xf32, #tpu.memory_space<vmem>>, vector<2x10xf32>,
    return
  }
}

</mosaic_0001>

<bundles_post_ra>
// kernel: tpu_custom_call.1
= control target key start
LH: loop header
LB: loop body
LE: loop exit
PB: predicated region body
PF: predicated region fallthrough
CT: control target
= control target key end

     0   :  { %v789_v47 = vmov 1983009808   ;;  %v158_v49 = vlaneseq  ;;  %s1227_s0 = inlined_call_operand.vmem [shape: f32[2,1024], index: 0, kind: input, shape index: {}]   ;;  %s1228_s1 = inlined_call_operand.vmem [shape: f32[1024,10], index: 1, kind: input, shape index: {}]   ;;  %s1229_s2 = inlined_call_operand.vmem [shape: f32[1,10], index: 2, kind: input, shape index: {}]   ;;  %s1230_s3 = inlined_call_operand.hbm [shape: f32[2,10], index: 3, kind: output, shape index: {}]  }
   0x1   :  { %v33_v0 = vld [vmem:[%s1228_s1 + $0x80] sm:$0xff]  ;;  %v34_v1 = vld [vmem:[%s1228_s1 + $0x88] sm:$0xff]  ;;  %v35_v11 = vld [vmem:[%s1228_s1 + $0x90] sm:$0xff]  ;;  %v156_v48 = vunpack.c.l.s4 %v789_v47 }
   0x2   :  { %v17_v2 = vld [vmem:[%s1228_s1] sm:$0xff]  ;;  %v633_v3 = vpack.c.bf16 %v34_v1, %v33_v0  ;;  %v18_v4 = vld [vmem:[%s1228_s1 + $0x8] sm:$0xff]  ;;  %v36_v13 = vld [vmem:[%s1228_s1 + $0x98] sm:$0xff]  ;;  %v159_v0 = vshrl.u32 %v158_v49, 7 }
   0x3   :  { %v65_v5 = vld [vmem:[%s1228_s1 + $0x180] sm:$0xff]  ;;  %v66_v6 = vld [vmem:[%s1228_s1 + $0x188] sm:$0xff]  ;;  %v635_v7 = vpack.c.bf16 %v18_v4, %v17_v2  ;;  %v19_v14 = vld [vmem:[%s1228_s1 + $0x10] sm:$0xff]  ;;  %v637_v16 = vpack.c.bf16 %v36_v13, %v35_v11  ;;  %v157_v63 = vunpack.c.0.s8 %v156_v48 }
   0x4   :  { %v665_v8 = vpack.c.bf16 %v66_v6, %v65_v5  ;;  %v49_v9 = vld [vmem:[%s1228_s1 + $0x100] sm:$0xff]  ;;  %v50_v10 = vld [vmem:[%s1228_s1 + $0x108] sm:$0xff]  ;;  %634 = vmatprep.subr.bf16.mxu0 %v633_v3  ;;  %v20_v15 = vld [vmem:[%s1228_s1 + $0x18] sm:$0xff] }
   0x5   :  { %v667_v12 = vpack.c.bf16 %v50_v10, %v49_v9  ;;  %636 = vmatpush3.bf16.msra.mxu0 %v635_v7  ;;  %v639_v17 = vpack.c.bf16 %v20_v15, %v19_v14  ;;  %v67_v18 = vld [vmem:[%s1228_s1 + $0x190] sm:$0xff]  ;;  %v68_v19 = vld [vmem:[%s1228_s1 + $0x198] sm:$0xff]  ;;  %v37_v23 = vld [vmem:[%s1228_s1 + $0xa0] sm:$0xff]  ;;  %v961_v13 = vsub.s32 %v157_v63, %v159_v0 }
   0x6   :  { %666 = vmatprep.subr.bf16.mxu1 %v665_v8  ;;  %v51_v20 = vld [vmem:[%s1228_s1 + $0x110] sm:$0xff]  ;;  %v669_v21 = vpack.c.bf16 %v68_v19, %v67_v18  ;;  %v52_v22 = vld [vmem:[%s1228_s1 + $0x118] sm:$0xff]  ;;  %v38_v24 = vld [vmem:[%s1228_s1 + $0xa8] sm:$0xff]  ;;  %638 = vmatprep.subr.bf16.mxu0 %v637_v16 }
   0x7   :  { %668 = vmatpush3.bf16.msra.mxu1 %v667_v12  ;;  %v671_v25 = vpack.c.bf16 %v52_v22, %v51_v20  ;;  %v641_v26 = vpack.c.bf16 %v38_v24, %v37_v23  ;;  %v21_v27 = vld [vmem:[%s1228_s1 + $0x20] sm:$0xff]  ;;  %v22_v28 = vld [vmem:[%s1228_s1 + $0x28] sm:$0xff]  ;;  %v39_v35 = vld [vmem:[%s1228_s1 + $0xb0] sm:$0xff] }
   0x8   :  { %v69_v29 = vld [vmem:[%s1228_s1 + $0x1a0] sm:$0xff]  ;;  %670 = vmatprep.subr.bf16.mxu1 %v669_v21  ;;  %v70_v30 = vld [vmem:[%s1228_s1 + $0x1a8] sm:$0xff]  ;;  %v643_v33 = vpack.c.bf16 %v22_v28, %v21_v27  ;;  %v40_v36 = vld [vmem:[%s1228_s1 + $0xb8] sm:$0xff] }
   0x9   :  { %v53_v31 = vld [vmem:[%s1228_s1 + $0x120] sm:$0xff]  ;;  %v54_v32 = vld [vmem:[%s1228_s1 + $0x128] sm:$0xff]  ;;  %640 = vmatpush3.bf16.msra.mxu0 %v639_v17  ;;  %v673_v34 = vpack.c.bf16 %v70_v30, %v69_v29  ;;  %v23_v37 = vld [vmem:[%s1228_s1 + $0x30] sm:$0xff]  ;;  %v645_v39 = vpack.c.bf16 %v40_v36, %v39_v35 }
   0xa   :  { %642 = vmatprep.subr.bf16.mxu0 %v641_v26  ;;  %v675_v38 = vpack.c.bf16 %v54_v32, %v53_v31  ;;  %v24_v40 = vld [vmem:[%s1228_s1 + $0x38] sm:$0xff]  ;;  %v71_v41 = vld [vmem:[%s1228_s1 + $0x1b0] sm:$0xff]  ;;  %v41_v46 = vld [vmem:[%s1228_s1 + $0xc0] sm:$0xff] }
   0xb   :  { %672 = vmatpush3.bf16.msra.mxu1 %v671_v25  ;;  %v72_v42 = vld [vmem:[%s1228_s1 + $0x1b8] sm:$0xff]  ;;  %v55_v44 = vld [vmem:[%s1228_s1 + $0x130] sm:$0xff]  ;;  %v42_v50 = vld [vmem:[%s1228_s1 + $0xc8] sm:$0xff]  ;;  %v647_v51 = vpack.c.bf16 %v24_v40, %v23_v37 }
   0xc   :  { %674 = vmatprep.subr.bf16.mxu1 %v673_v34  ;;  %v677_v43 = vpack.c.bf16 %v72_v42, %v71_v41  ;;  %v56_v45 = vld [vmem:[%s1228_s1 + $0x138] sm:$0xff]  ;;  %v73_v52 = vld [vmem:[%s1228_s1 + $0x1c0] sm:$0xff]  ;;  %v74_v53 = vld [vmem:[%s1228_s1 + $0x1c8] sm:$0xff]  ;;  %v649_v55 = vpack.c.bf16 %v42_v50, %v41_v46 }
   0xd   :  { %644 = vmatpush3.bf16.msra.mxu0 %v643_v33  ;;  %v679_v54 = vpack.c.bf16 %v56_v45, %v55_v44  ;;  %v25_v56 = vld [vmem:[%s1228_s1 + $0x40] sm:$0xff]  ;;  %v26_v57 = vld [vmem:[%s1228_s1 + $0x48] sm:$0xff]  ;;  %v681_v59 = vpack.c.bf16 %v74_v53, %v73_v52  ;;  %v43_v61 = vld [vmem:[%s1228_s1 + $0xd0] sm:$0xff] }
   0xe   :  { %646 = vmatprep.subr.bf16.mxu0 %v645_v39  ;;  %v57_v58 = vld [vmem:[%s1228_s1 + $0x140] sm:$0xff]  ;;  %v58_v60 = vld [vmem:[%s1228_s1 + $0x148] sm:$0xff]  ;;  %v44_v62 = vld [vmem:[%s1228_s1 + $0xd8] sm:$0xff]  ;;  %v651_v3 = vpack.c.bf16 %v26_v57, %v25_v56 }
   0xf   :  { %676 = vmatpush3.bf16.msra.mxu1 %v675_v38  ;;  %v75_v1 = vld [vmem:[%s1228_s1 + $0x1d0] sm:$0xff]  ;;  %v76_v2 = vld [vmem:[%s1228_s1 + $0x1d8] sm:$0xff]  ;;  %v683_v4 = vpack.c.bf16 %v58_v60, %v57_v58  ;;  %v653_v5 = vpack.c.bf16 %v44_v62, %v43_v61  ;;  %v45_v11 = vld [vmem:[%s1228_s1 + $0xe0] sm:$0xff] }
  0x10   :  { %678 = vmatprep.subr.bf16.mxu1 %v677_v43  ;;  %v27_v6 = vld [vmem:[%s1228_s1 + $0x50] sm:$0xff]  ;;  %v28_v7 = vld [vmem:[%s1228_s1 + $0x58] sm:$0xff]  ;;  %v685_v9 = vpack.c.bf16 %v76_v2, %v75_v1  ;;  %v46_v12 = vld [vmem:[%s1228_s1 + $0xe8] sm:$0xff] }
  0x11   :  { %648 = vmatpush3.bf16.msra.mxu0 %v647_v51  ;;  %v59_v8 = vld [vmem:[%s1228_s1 + $0x150] sm:$0xff]  ;;  %v60_v10 = vld [vmem:[%s1228_s1 + $0x158] sm:$0xff]  ;;  %v77_v14 = vld [vmem:[%s1228_s1 + $0x1e0] sm:$0xff]  ;;  %v655_v16 = vpack.c.bf16 %v28_v7, %v27_v6  ;;  %v657_v19 = vpack.c.bf16 %v46_v12, %v45_v11 }
  0x12   :  { %650 = vmatprep.subr.bf16.mxu0 %v649_v55  ;;  %v78_v15 = vld [vmem:[%s1228_s1 + $0x1e8] sm:$0xff]  ;;  %v29_v17 = vld [vmem:[%s1228_s1 + $0x60] sm:$0xff]  ;;  %v687_v18 = vpack.c.bf16 %v60_v10, %v59_v8  ;;  %v47_v25 = vld [vmem:[%s1228_s1 + $0xf0] sm:$0xff] }
  0x13   :  { %680 = vmatpush3.bf16.msra.mxu1 %v679_v54  ;;  %v30_v20 = vld [vmem:[%s1228_s1 + $0x68] sm:$0xff]  ;;  %v61_v21 = vld [vmem:[%s1228_s1 + $0x160] sm:$0xff]  ;;  %v689_v23 = vpack.c.bf16 %v78_v15, %v77_v14  ;;  %v48_v26 = vld [vmem:[%s1228_s1 + $0xf8] sm:$0xff] }
  0x14   :  { %682 = vmatprep.subr.bf16.mxu1 %v681_v59  ;;  %v15_v22 = vld [vmem:[%s1227_s0] sm:$0xff]  ;;  %v62_v24 = vld [vmem:[%s1228_s1 + $0x168] sm:$0xff]  ;;  %v79_v29 = vld [vmem:[%s1228_s1 + $0x1f0] sm:$0xff]  ;;  %v659_v31 = vpack.c.bf16 %v30_v20, %v29_v17  ;;  %v661_v35 = vpack.c.bf16 %v48_v26, %v47_v25 }
  0x15   :  { %652 = vmatpush3.bf16.msra.mxu0 %v651_v3  ;;  %v161_v27 = vrot.slane %v15_v22, %v961_v13  ;;  %v154_v28 = vcombine.high %v15_v22, %v15_v22  ;;  %v80_v30 = vld [vmem:[%s1228_s1 + $0x1f8] sm:$0xff]  ;;  %v691_v34 = vpack.c.bf16 %v62_v24, %v61_v21  ;;  %v31_v36 = vld [vmem:[%s1228_s1 + $0x70] sm:$0xff]  ;;  %v97_v41 = vld [vmem:[%s1228_s1 + $0x280] sm:$0xff] }
  0x16   :  { %654 = vmatprep.subr.bf16.mxu0 %v653_v5  ;;  %v32_v37 = vld [vmem:[%s1228_s1 + $0x78] sm:$0xff]  ;;  %v63_v38 = vld [vmem:[%s1228_s1 + $0x170] sm:$0xff]  ;;  %v693_v39 = vpack.c.bf16 %v80_v30, %v79_v29  ;;  %v98_v42 = vld [vmem:[%s1228_s1 + $0x288] sm:$0xff] }
  0x17   :  { %684 = vmatpush3.bf16.msra.mxu1 %v683_v4  ;;  %v169_v32 = vcombine.high %v161_v27, %v161_v27  ;;  %v168_v33 = vrot.slane %v154_v28, %v961_v13  ;;  %v64_v40 = vld [vmem:[%s1228_s1 + $0x178] sm:$0xff]  ;;  %v129_v44 = vld [vmem:[%s1228_s1 + $0x380] sm:$0xff]  ;;  %v130_v45 = vld [vmem:[%s1228_s1 + $0x388] sm:$0xff]  ;;  %v663_v46 = vpack.c.bf16 %v32_v37, %v31_v36  ;;  %v697_v48 = vpack.c.bf16 %v98_v42, %v97_v41 }
  0x18   :  { %686 = vmatprep.subr.bf16.mxu1 %v685_v9  ;;  %v695_v47 = vpack.c.bf16 %v64_v40, %v63_v38  ;;  %v81_v49 = vld [vmem:[%s1228_s1 + $0x200] sm:$0xff]  ;;  %v82_v50 = vld [vmem:[%s1228_s1 + $0x208] sm:$0xff]  ;;  %v729_v52 = vpack.c.bf16 %v130_v45, %v129_v44  ;;  %v99_v54 = vld [vmem:[%s1228_s1 + $0x290] sm:$0xff] }
  0x19   :  { %656 = vmatpush3.bf16.msra.mxu0 %v655_v16  ;;  %260 = vmatprep.mubr.f32.mxu0 %v169_v32  ;;  %v170_v43 = vcombine.high %v168_v33, %v168_v33  ;;  %v113_v51 = vld [vmem:[%s1228_s1 + $0x300] sm:$0xff]  ;;  %v114_v53 = vld [vmem:[%s1228_s1 + $0x308] sm:$0xff]  ;;  %v100_v55 = vld [vmem:[%s1228_s1 + $0x298] sm:$0xff]  ;;  %v699_v58 = vpack.c.bf16 %v82_v50, %v81_v49 }
  0x1a   :  { %658 = vmatprep.subr.bf16.mxu0 %v657_v19  ;;  %v131_v56 = vld [vmem:[%s1228_s1 + $0x390] sm:$0xff]  ;;  %v132_v57 = vld [vmem:[%s1228_s1 + $0x398] sm:$0xff]  ;;  %v731_v59 = vpack.c.bf16 %v114_v53, %v113_v51  ;;  %v701_v60 = vpack.c.bf16 %v100_v55, %v99_v54  ;;  %v101_v2 = vld [vmem:[%s1228_s1 + $0x2a0] sm:$0xff] }
  0x1b   :  { %688 = vmatpush3.bf16.msra.mxu1 %v687_v18  ;;  %330 = vmatprep.mubr.f32.mxu1 %v170_v43  ;;  %v83_v61 = vld [vmem:[%s1228_s1 + $0x210] sm:$0xff]  ;;  %v84_v62 = vld [vmem:[%s1228_s1 + $0x218] sm:$0xff]  ;;  %v733_v0 = vpack.c.bf16 %v132_v57, %v131_v56  ;;  %v102_v3 = vld [vmem:[%s1228_s1 + $0x2a8] sm:$0xff] }
  0x1c   :  { %690 = vmatprep.subr.bf16.mxu1 %v689_v23  ;;  %v115_v63 = vld [vmem:[%s1228_s1 + $0x310] sm:$0xff]  ;;  %v116_v1 = vld [vmem:[%s1228_s1 + $0x318] sm:$0xff]  ;;  %v133_v4 = vld [vmem:[%s1228_s1 + $0x3a0] sm:$0xff]  ;;  %v703_v6 = vpack.c.bf16 %v84_v62, %v83_v61  ;;  %v705_v8 = vpack.c.bf16 %v102_v3, %v101_v2 }
  0x1d   :  { %660 = vmatpush3.bf16.msra.mxu0 %v659_v31  ;;  %v134_v5 = vld [vmem:[%s1228_s1 + $0x3a8] sm:$0xff]  ;;  %v735_v7 = vpack.c.bf16 %v116_v1, %v115_v63  ;;  %v85_v9 = vld [vmem:[%s1228_s1 + $0x220] sm:$0xff]  ;;  %v103_v15 = vld [vmem:[%s1228_s1 + $0x2b0] sm:$0xff] }
  0x1e   :  { %662 = vmatprep.subr.bf16.mxu0 %v661_v35  ;;  %v86_v10 = vld [vmem:[%s1228_s1 + $0x228] sm:$0xff]  ;;  %v117_v11 = vld [vmem:[%s1228_s1 + $0x320] sm:$0xff]  ;;  %v737_v12 = vpack.c.bf16 %v134_v5, %v133_v4  ;;  %v104_v16 = vld [vmem:[%s1228_s1 + $0x2b8] sm:$0xff] }
  0x1f   :  { %692 = vmatpush3.bf16.msra.mxu1 %v691_v34  ;;  %v118_v14 = vld [vmem:[%s1228_s1 + $0x328] sm:$0xff]  ;;  %v135_v17 = vld [vmem:[%s1228_s1 + $0x3b0] sm:$0xff]  ;;  %v136_v18 = vld [vmem:[%s1228_s1 + $0x3b8] sm:$0xff]  ;;  %v707_v19 = vpack.c.bf16 %v86_v10, %v85_v9  ;;  %v709_v22 = vpack.c.bf16 %v104_v16, %v103_v15 }
  0x20   :  { %694 = vmatprep.subr.bf16.mxu1 %v693_v39  ;;  %v87_v20 = vld [vmem:[%s1228_s1 + $0x230] sm:$0xff]  ;;  %v739_v21 = vpack.c.bf16 %v118_v14, %v117_v11  ;;  %v88_v23 = vld [vmem:[%s1228_s1 + $0x238] sm:$0xff]  ;;  %v741_v26 = vpack.c.bf16 %v136_v18, %v135_v17  ;;  %v106_v28 = vld [vmem:[%s1228_s1 + $0x2c8] sm:$0xff] }
  0x21   :  { %664 = vmatpush3.bf16.msra.mxu0 %v663_v46  ;;  %v119_v24 = vld [vmem:[%s1228_s1 + $0x330] sm:$0xff]  ;;  %v120_v25 = vld [vmem:[%s1228_s1 + $0x338] sm:$0xff]  ;;  %v137_v29 = vld [vmem:[%s1228_s1 + $0x3c0] sm:$0xff] }
  0x22   :  { %698 = vmatprep.subr.bf16.mxu0 %v697_v48  ;;  %v138_v30 = vld [vmem:[%s1228_s1 + $0x3c8] sm:$0xff] }
  0x23   :  { %696 = vmatpush3.bf16.msra.mxu1 %v695_v47  ;;  %v16_v31 = vld [vmem:[%s1227_s0 + $0x8] sm:$0xff] }
  0x24   :  { %730 = vmatprep.subr.bf16.mxu1 %v729_v52  ;;  %261 = vmatmul.mubr.f32.vlgmr.msra.gmra.mrb[0].mxu0 %v161_v27  ;;  %v105_v27 = vld [vmem:[%s1228_s1 + $0x2c0] sm:$0xff] }
  0x25   :  { %700 = vmatpush3.bf16.msra.mxu0 %v699_v58 }
  0x26   :  { %331 = vmatmul.mubr.f32.vlgmr.msra.gmra.mrb[0].mxu1 %v168_v33  ;;  %702 = vmatprep.subr.bf16.mxu0 %v701_v60 }
  0x27   :  { %732 = vmatpush3.bf16.msra.mxu1 %v731_v59 }
  0x28   :  { %734 = vmatprep.subr.bf16.mxu1 %v733_v0 }
  0x29   :  { %704 = vmatpush3.bf16.msra.mxu0 %v703_v6 }
  0x2a   :  { %706 = vmatprep.subr.bf16.mxu0 %v705_v8 }
  0x2b   :  { %736 = vmatpush3.bf16.msra.mxu1 %v735_v7 }
  0x2c   :  { %738 = vmatprep.subr.bf16.mxu1 %v737_v12 }
  0x2d   :  { %8 = vsyncpa [#allocation3], 0  ;;  %708 = vmatpush3.bf16.msra.mxu0 %v707_v19  ;;  %v711_v32 = vpack.c.bf16 %v88_v23, %v87_v20  ;;  %v1122_v33 = vrot.slane %v16_v31, %v961_v13  ;;  %v171_v34 = vcombine.high %v16_v31, %v16_v31  ;;  %v743_v35 = vpack.c.bf16 %v120_v25, %v119_v24  ;;  %v89_v37 = vld [vmem:[%s1228_s1 + $0x240] sm:$0xff]  ;;  %v90_v38 = vld [vmem:[%s1228_s1 + $0x248] sm:$0xff] }
  0x2e   :  { %710 = vmatprep.subr.bf16.mxu0 %v709_v22  ;;  %v713_v36 = vpack.c.bf16 %v106_v28, %v105_v27  ;;  %v121_v39 = vld [vmem:[%s1228_s1 + $0x340] sm:$0xff]  ;;  %v745_v40 = vpack.c.bf16 %v138_v30, %v137_v29  ;;  %v122_v41 = vld [vmem:[%s1228_s1 + $0x348] sm:$0xff]  ;;  %v107_v42 = vld [vmem:[%s1228_s1 + $0x2d0] sm:$0xff]  ;;  %v715_v48 = vpack.c.bf16 %v90_v38, %v89_v37  ;;  %vm476_vm0 = vcmask 74752  }
  0x2f   :  { %740 = vmatpush3.bf16.msra.mxu1 %v739_v21  ;;  %v108_v43 = vld [vmem:[%s1228_s1 + $0x2d8] sm:$0xff]  ;;  %v186_v44 = vcombine.high %v1122_v33, %v1122_v33  ;;  %v185_v45 = vrot.slane %v171_v34, %v961_v13  ;;  %v139_v46 = vld [vmem:[%s1228_s1 + $0x3d0] sm:$0xff]  ;;  %v747_v50 = vpack.c.bf16 %v122_v41, %v121_v39  ;;  %v109_v56 = vld [vmem:[%s1228_s1 + $0x2e0] sm:$0xff] }
  0x30   :  { %742 = vmatprep.subr.bf16.mxu1 %v741_v26  ;;  %v140_v47 = vld [vmem:[%s1228_s1 + $0x3d8] sm:$0xff]  ;;  %v717_v51 = vpack.c.bf16 %v108_v43, %v107_v42  ;;  %v91_v13 = vld [vmem:[%s1228_s1 + $0x250] sm:$0xff]  ;;  %v110_v57 = vld [vmem:[%s1228_s1 + $0x2e8] sm:$0xff] }
  0x31   :  { %712 = vmatpush3.bf16.msra.mxu0 %v711_v32  ;;  %400 = vmatprep.mubr.f32.mxu0 %v186_v44  ;;  %v187_v49 = vcombine.high %v185_v45, %v185_v45  ;;  %v92_v52 = vld [vmem:[%s1228_s1 + $0x258] sm:$0xff]  ;;  %v123_v53 = vld [vmem:[%s1228_s1 + $0x350] sm:$0xff]  ;;  %v749_v54 = vpack.c.bf16 %v140_v47, %v139_v46  ;;  %v141_v58 = vld [vmem:[%s1228_s1 + $0x3e0] sm:$0xff]  ;;  %v721_v62 = vpack.c.bf16 %v110_v57, %v109_v56 }
  0x32   :  { %714 = vmatprep.subr.bf16.mxu0 %v713_v36  ;;  %v124_v55 = vld [vmem:[%s1228_s1 + $0x358] sm:$0xff]  ;;  %v142_v59 = vld [vmem:[%s1228_s1 + $0x3e8] sm:$0xff]  ;;  %v719_v60 = vpack.c.bf16 %v92_v52, %v91_v13  ;;  %v93_v63 = vld [vmem:[%s1228_s1 + $0x260] sm:$0xff] }
  0x33   :  { %744 = vmatpush3.bf16.msra.mxu1 %v743_v35  ;;  %470 = vmatprep.mubr.f32.mxu1 %v187_v49  ;;  %v751_v61 = vpack.c.bf16 %v124_v55, %v123_v53  ;;  %v94_v0 = vld [vmem:[%s1228_s1 + $0x268] sm:$0xff]  ;;  %v125_v1 = vld [vmem:[%s1228_s1 + $0x360] sm:$0xff]  ;;  %v753_v2 = vpack.c.bf16 %v142_v59, %v141_v58  ;;  %v111_v4 = vld [vmem:[%s1228_s1 + $0x2f0] sm:$0xff] }
  0x34   :  { %746 = vmatprep.subr.bf16.mxu1 %v745_v40  ;;  %v126_v3 = vld [vmem:[%s1228_s1 + $0x368] sm:$0xff]  ;;  %v112_v5 = vld [vmem:[%s1228_s1 + $0x2f8] sm:$0xff]  ;;  %v143_v6 = vld [vmem:[%s1228_s1 + $0x3f0] sm:$0xff]  ;;  %v723_v8 = vpack.c.bf16 %v94_v0, %v93_v63 }
  0x35   :  { %716 = vmatpush3.bf16.msra.mxu0 %v715_v48  ;;  %v144_v7 = vld [vmem:[%s1228_s1 + $0x3f8] sm:$0xff]  ;;  %v755_v9 = vpack.c.bf16 %v126_v3, %v125_v1  ;;  %v725_v10 = vpack.c.bf16 %v112_v5, %v111_v4  ;;  %v95_v11 = vld [vmem:[%s1228_s1 + $0x270] sm:$0xff]  ;;  %v492_v20 = vld [vmem:[%s1229_s2] ss:$0 sm:$0xff] }
  0x36   :  { %718 = vmatprep.subr.bf16.mxu0 %v717_v51  ;;  %v96_v12 = vld [vmem:[%s1228_s1 + $0x278] sm:$0xff]  ;;  %v757_v14 = vpack.c.bf16 %v144_v7, %v143_v6  ;;  %v127_v15 = vld [vmem:[%s1228_s1 + $0x370] sm:$0xff] }
  0x37   :  { %748 = vmatpush3.bf16.msra.mxu1 %v747_v50  ;;  %v128_v16 = vld [vmem:[%s1228_s1 + $0x378] sm:$0xff]  ;;  %v727_v17 = vpack.c.bf16 %v96_v12, %v95_v11  ;;  %s790_s1 = smov [#allocation2]  }
  0x38   :  { %750 = vmatprep.subr.bf16.mxu1 %v749_v54  ;;  %v759_v18 = vpack.c.bf16 %v128_v16, %v127_v15  ;;  %s484_s29 = sshll.u32 %s790_s1, 4  ;;  %s485_s29 = int_to_ptr.vmem [resolvable:$true] %s484_s29 }
  0x39   :  { %720 = vmatpush3.bf16.msra.mxu0 %v719_v60  ;;  %s765_s2 = scalar_lea.vmem %s485_s29, 32  ;;  %p770_p1 = scmp.lt.s32.totalorder %s485_s29, %s485_s29 }
  0x3a   :  { %722 = vmatprep.subr.bf16.mxu0 %v721_v62  ;;  %p766_p0 = scmp.ne.s32.totalorder %s485_s29, %s765_s2  ;;  %p771_p2 = scmp.lt.s32.totalorder %s765_s2, %s765_s2 }
  0x3b   :  { %752 = vmatpush3.bf16.msra.mxu1 %v751_v61 }
  0x3c   :  { %754 = vmatprep.subr.bf16.mxu1 %v753_v2  ;;  %p772_p3 = por %p771_p2, %p770_p1 }
  0x3d   :  { %724 = vmatpush3.bf16.msra.mxu0 %v723_v8 }
  0x3e   :  { %726 = vmatprep.subr.bf16.mxu0 %v725_v10  ;;  %p773_p4 = pnand %p772_p3, %p766_p0 }
  0x3f   :  { %756 = vmatpush3.bf16.msra.mxu1 %v755_v9 }
  0x40   :  { %758 = vmatprep.subr.bf16.mxu1 %v757_v14 }
  0x41   :  { %728 = vmatpush3.bf16.msra.mxu0 %v727_v17 }
  0x43   :  { %760 = vmatpush3.bf16.msra.mxu1 %v759_v18 }
  0x44   :  { %401 = vmatmul.mubr.f32.vlgmr.msra.gmra.mrb[2].mxu0 %v1122_v33 }
  0x46   :  { %471 = vmatmul.mubr.f32.vlgmr.msra.gmra.mrb[2].mxu1 %v185_v45 }
  0xf7   :  { %v525_v19 = vpop.f32.mrb[0].mxu0 }
  0xf8   :  { %v526_v21 = vpop.f32.mrb[1].mxu0 }
  0xf9   :  { %v560_v22 = vpop.f32.mrb[0].mxu1  ;;  %v527_v23 = vadd.f32 %v526_v21, %v525_v19 }
  0xfa   :  { %v561_v24 = vpop.f32.mrb[1].mxu1 }
  0xfb   :  { %v562_v25 = vadd.f32 %v561_v24, %v560_v22  ;;  %v263_v26 = vadd.f32 %v527_v23, %v492_v20 }
  0xfd   :  { %v333_v27 = vadd.f32 %v562_v25, %v263_v26 }
 0x117   :  { %v595_v28 = vpop.f32.mrb[2].mxu0 }
 0x118   :  { %v596_v29 = vpop.f32.mrb[3].mxu0 }
 0x119   :  { %v630_v30 = vpop.f32.mrb[2].mxu1  ;;  %v597_v31 = vadd.f32 %v596_v29, %v595_v28 }
 0x11a   :  { %v631_v32 = vpop.f32.mrb[3].mxu1 }
 0x11b   :  { %v632_v34 = vadd.f32 %v631_v32, %v630_v30  ;;  %v403_v33 = vadd.f32 %v597_v31, %v333_v27 }
 0x11d   :  { %v473_v35 = vadd.f32 %v632_v34, %v403_v33 }
 0x11f   :  { %477 = vst.msk [vmem:[#allocation2] sm:$0x3] %vm476_vm0, %v473_v35 }
 0x120   :  { %776 = shalt.err (!%p773_p4)
}
 0x121   :  { %s777_s4 = scalar_lea.hbm %s1230_s3, 32 }
 0x122   :  { %p778_p5 = scmp.ne.s32.totalorder %s1230_s3, %s777_s4  ;;  %p781_p6 = scmp.lt.u32.totalorder %s777_s4, %s1230_s3 }
 0x124   :  { %p783_p7 = pnand %p781_p6, %p778_p5 }
 0x126   :  { %786 = shalt.err (!%p783_p7)
}
 0x127   :  { %487 = dma.vmem_to_hbm [thread:$0]  %s485_s29, 32, %s1230_s3, [#allocation3]  }
 0x128   :  { %787 = dma.done.wait [#allocation3], 32  }
 0x129   :  { %788 = vsyncadd [#allocation3], 4294967264 }
 0x12a   :  { %491 = vsyncpa [#allocation3], 1 }

</bundles_post_ra>
